<compile_context>
chip_gen: v5e
topology: v5e:2x2
jax: 0.10.0
libtpu: 0.0.40
codegen_flags: <defaults>
</compile_context>

<pallas_src>
import functools
import math

import jax
import jax.numpy as jnp
import numpy as np
from jax.experimental import pallas as pl
from jax.experimental.pallas import tpu as pltpu


# ------------------------- fused conv + attention -------------------------- #
def _fused_mha_kernel(q_ref, u_ref, wblk_ref, bblk_ref, wl_ref, bl_ref, o_ref,
                      *, h, compute_dtype):
    # q_ref:    (B*h, S, d_k)  f32, head-major packed query (wrapper-prepared)
    # u_ref:    (2*K*S, B*d_model) bf16, im2col'd [key; value] conv inputs
    # wblk_ref: (2*S, 2*K*S)   bf16, block-diag im2col conv weights [Wk 0; 0 Wv]
    # bblk_ref: (2*S, 1)       f32, [bk; bv]
    # wl_ref:   (d_model, d_model) bf16 = torch lin_w.T
    # bl_ref:   (1, d_model)   f32
    # o_ref:    (B, S*d_model) lane-dense output slab
    BH, S, d_k = q_ref.shape
    B = BH // h
    d_model = h * d_k
    scale = 1.0 / math.sqrt(d_k)

    # Both causal convs, all batches: ONE block-diagonal MXU matmul,
    # f32 accumulation, biases added once.
    kv = jnp.dot(wblk_ref[...], u_ref[...],
                 preferred_element_type=jnp.float32) + bblk_ref[...]
    kvb = kv.astype(compute_dtype)                 # (2S, B*d_model)

    # Head split of the conv outputs, (b-major, head-minor) to match q packing.
    def heads(rows):                               # rows: (S, B*d_model)
        return jnp.stack(
            [rows[:, b * d_model + i * d_k: b * d_model + (i + 1) * d_k]
             for b in range(B) for i in range(h)], axis=0)   # (B*h, S, d_k)

    kh = heads(kvb[:S])
    vh = heads(kvb[S:])
    qh = (q_ref[...] * scale).astype(compute_dtype)   # scale folded into cast

    # Batched attention over all (batch, head) pairs; softmax stays in f32.
    scores = jnp.einsum("hqd,hkd->hqk", qh, kh,
                        preferred_element_type=jnp.float32)
    scores = scores - jnp.max(scores, axis=-1, keepdims=True)
    p = jnp.exp(scores)
    p = p * pl.reciprocal(jnp.sum(p, axis=-1, keepdims=True), approx=False)
    xh = jnp.einsum("hqk,hkd->hqd", p.astype(compute_dtype), vh,
                    preferred_element_type=jnp.float32)       # (B*h, S, d_k)

    # Merge heads -> (B*S, d_model); ONE projection matmul + bias.
    x_cat = jnp.concatenate(
        [jnp.concatenate([xh[b * h + i] for i in range(h)], axis=-1)
         for b in range(B)], axis=0)                           # (B*S, d_model)
    out = jnp.dot(x_cat.astype(compute_dtype), wl_ref[...],
                  preferred_element_type=jnp.float32) + bl_ref[...]

    # Lane-dense (B, S*d_model) store: 2 x 256-lane rows, unmasked vst.
    out_flat = jnp.concatenate(
        [jnp.concatenate([out[b * S + s: b * S + s + 1, :] for s in range(S)],
                         axis=-1)
         for b in range(B)], axis=0)                           # (B, S*d_model)
    o_ref[...] = out_flat.astype(o_ref.dtype)


def multi_headed_attention(query, key, value, params, h,
                           compute_dtype=jnp.bfloat16):
    """query/key/value: (B, S, d_model). params use torch layouts."""
    B, S, d_model = query.shape
    d_k = d_model // h
    K = params["conv1_w"].shape[2]
    pad = K - 1

    # ---- wrapper-side layout plumbing (XLA, executed once) -----------------
    # im2col of the causally left-padded conv inputs, batches stacked on lanes.
    def im2col(x):
        xp = jnp.pad(x, ((0, 0), (0, 0), (pad, 0)))            # (B, S, dm+pad)
        u = jnp.concatenate([xp[:, :, k:k + d_model] for k in range(K)],
                            axis=1)                            # (B, K*S, dm)
        return u.transpose(1, 0, 2).reshape(K * S, B * d_model)

    u_all = jnp.concatenate([im2col(key), im2col(value)],
                            axis=0).astype(compute_dtype)      # (2KS, B*dm)

    # im2col conv weights W2[co, k*C_in + ci] = w[co, ci, k]; block-diag fuse.
    def im2col_w(w):
        return jnp.transpose(w, (0, 2, 1)).reshape(w.shape[0], -1)

    wk2 = im2col_w(params["conv1_w"])
    wv2 = im2col_w(params["conv2_w"])
    zeros = jnp.zeros_like(wk2)
    w_blk = jnp.concatenate(
        [jnp.concatenate([wk2, zeros], axis=1),
         jnp.concatenate([zeros, wv2], axis=1)],
        axis=0).astype(compute_dtype)                          # (2S, 2KS)
    b_blk = jnp.concatenate([params["conv1_b"],
                             params["conv2_b"]]).reshape(2 * S, 1)

    # Head-major query packing (b-major, head-minor): (B*h, S, d_k), f32.
    q_packed = query.reshape(B, S, h, d_k).transpose(0, 2, 1, 3)
    q_packed = q_packed.reshape(B * h, S, d_k)

    wl = params["lin_w"].T.astype(compute_dtype)   # torch Linear: y = x W.T + b
    bl = params["lin_b"].reshape(1, d_model)

    kernel = functools.partial(_fused_mha_kernel, h=h,
                               compute_dtype=compute_dtype)

    out_flat = pl.pallas_call(
        kernel,
        out_shape=jax.ShapeDtypeStruct((B, S * d_model), query.dtype),
        grid_spec=pltpu.PrefetchScalarGridSpec(
            num_scalar_prefetch=0,
            grid=(1,),                             # single step over ALL batches
            in_specs=[
                pl.BlockSpec((B * h, S, d_k), lambda i: (0, 0, 0)),
                pl.BlockSpec((2 * K * S, B * d_model), lambda i: (0, 0)),
                pl.BlockSpec((2 * S, 2 * K * S), lambda i: (0, 0)),
                pl.BlockSpec((2 * S, 1), lambda i: (0, 0)),
                pl.BlockSpec((d_model, d_model), lambda i: (0, 0)),
                pl.BlockSpec((1, d_model), lambda i: (0, 0)),
            ],
            out_specs=pl.BlockSpec((B, S * d_model), lambda i: (0, 0)),
        ),
        compiler_params=pltpu.CompilerParams(
            dimension_semantics=("arbitrary",)),
    )(q_packed, u_all, w_blk, b_blk, wl, bl)

    return out_flat.reshape(B, S, d_model)


# ------------------------------ reference ---------------------------------- #
def _reference(query, key, value, params, h):
    B, S, d_model = query.shape
    d_k = d_model // h

    def conv_ref(x, w, b):
        pad = w.shape[2] - 1
        x_pad = jnp.pad(x, ((0, 0), (0, 0), (pad, 0)))
        y = jax.lax.conv_general_dilated(
            x_pad, w, window_strides=(1,), padding="VALID",
            dimension_numbers=("NCH", "OIH", "NCH"))
        return y + b[None, :, None]

    key_c = conv_ref(key, params["conv1_w"], params["conv1_b"])
    val_c = conv_ref(value, params["conv2_w"], params["conv2_b"])

    def split(x):
        return x.reshape(B, S, h, d_k).transpose(0, 2, 1, 3)

    q, k, v = split(query), split(key_c), split(val_c)
    scores = jnp.einsum("bhqd,bhkd->bhqk", q, k) / math.sqrt(d_k)
    p = jax.nn.softmax(scores, axis=-1)
    x = jnp.einsum("bhqk,bhkd->bhqd", p, v)
    x = x.transpose(0, 2, 1, 3).reshape(B, S, d_model)
    return x @ params["lin_w"].T + params["lin_b"]


# --------------------------------- main ------------------------------------ #
if __name__ == "__main__":
    # Small, module-consistent shapes.
    B = 2                      # batch
    afr = 8                    # afr_reduced_cnn_size (seq length / conv channels)
    d_model = 32               # feature dim / conv length
    h = 4                      # heads
    K = 7                      # causal conv kernel size

    root = jax.random.PRNGKey(0)
    ks = jax.random.split(root, 10)

    params = {
        "conv1_w": 0.1 * jax.random.normal(ks[0], (afr, afr, K), jnp.float32),
        "conv1_b": 0.1 * jax.random.normal(ks[1], (afr,), jnp.float32),
        "conv2_w": 0.1 * jax.random.normal(ks[2], (afr, afr, K), jnp.float32),
        "conv2_b": 0.1 * jax.random.normal(ks[3], (afr,), jnp.float32),
        "lin_w": 0.1 * jax.random.normal(ks[4], (d_model, d_model), jnp.float32),
        "lin_b": 0.1 * jax.random.normal(ks[5], (d_model,), jnp.float32),
    }

    query = jax.random.normal(ks[6], (B, afr, d_model), jnp.float32)
    key = jax.random.normal(ks[7], (B, afr, d_model), jnp.float32)
    value = jax.random.normal(ks[8], (B, afr, d_model), jnp.float32)

    out = multi_headed_attention(query, key, value, params, h)
    out = jax.block_until_ready(out)

    ref = _reference(query, key, value, params, h)
    # bf16 MXU operands (f32 accumulation) -> slightly looser tolerance than f32.
    np.testing.assert_allclose(np.asarray(out), np.asarray(ref),
                               rtol=3e-2, atol=3e-2)

    print("KERNEL_OK")
</pallas_src>

<mosaic_0001>
module attributes {stable_mosaic.version = 11 : i64} {
  func.func @_fused_mha_kernel(%arg0: i32, %arg1: memref<8x8x8xf32, #tpu.memory_space<vmem>>, %arg2: memref<112x64xbf16, #tpu.memory_space<vmem>>, %arg3: memref<16x112xbf16, #tpu.memory_space<vmem>>, %arg4: memref<16x1xf32, #tpu.memory_space<vmem>>, %arg5: memref<32x32xbf16, #tpu.memory_space<vmem>>, %arg6: memref<1x32xf32, #tpu.memory_space<vmem>>, %arg7: memref<2x256xf32, #tpu.memory_space<vmem>>) attributes {dimension_semantics = [#tpu.dimension_semantics<arbitrary>], iteration_bounds = array<i64: 1>, scalar_prefetch = 0 : i64, scratch_operands = 0 : i64, tpu.core_type = #tpu.core_type<tc>, window_params = [{pipeline_mode = #tpu.pipeline_mode<synchronous>, transform_indices = @transform_0, window_bounds = array<i64: 8, 8, 8>}, {pipeline_mode = #tpu.pipeline_mode<synchronous>, transform_indices = @transform_1, window_bounds = array<i64: 112, 64>}, {pipeline_mode = #tpu.pipeline_mode<synchronous>, transform_indices = @transform_2, window_bounds = array<i64: 16, 112>}, {pipeline_mode = #tpu.pipeline_mode<synchronous>, transform_indices = @transform_3, window_bounds = array<i64: 16, 1>}, {pipeline_mode = #tpu.pipeline_mode<synchronous>, transform_indices = @transform_4, window_bounds = array<i64: 32, 32>}, {pipeline_mode = #tpu.pipeline_mode<synchronous>, transform_indices = @transform_5, window_bounds = array<i64: 1, 32>}, {pipeline_mode = #tpu.pipeline_mode<synchronous>, transform_indices = @transform_6, window_bounds = array<i64: 2, 256>}]} {
    %c0 = arith.constant 0 : index
    %c0_0 = arith.constant 0 : index
    %0 = vector.load %arg3[%c0, %c0_0] : memref<16x112xbf16, #tpu.memory_space<vmem>>, vector<16x112xbf16>
    %c0_1 = arith.constant 0 : index
    %c0_2 = arith.constant 0 : index
    %1 = vector.load %arg2[%c0_1, %c0_2] : memref<112x64xbf16, #tpu.memory_space<vmem>>, vector<112x64xbf16>
    %cst = arith.constant dense<0.000000e+00> : vector<16x64xf32>
    %2 = tpu.matmul %0, %1, %cst {dimension_numbers = #tpu.dot_dimension_numbers<[1], [0], [0], [1], [0, 0, 1, 1], [], []>} : vector<16x112xbf16>, vector<112x64xbf16>, vector<16x64xf32> -> vector<16x64xf32>
    %c0_3 = arith.constant 0 : index
    %c0_4 = arith.constant 0 : index
    %3 = vector.load %arg4[%c0_3, %c0_4] : memref<16x1xf32, #tpu.memory_space<vmem>>, vector<16x1xf32>
    %4 = vector.broadcast %3 : vector<16x1xf32> to vector<16x64xf32>
    %5 = arith.addf %2, %4 : vector<16x64xf32>
    %6 = arith.truncf %5 : vector<16x64xf32> to vector<16x64xbf16>
    %7 = vector.extract_strided_slice %6 {offsets = [0, 0], sizes = [8, 64], strides = [1, 1]} : vector<16x64xbf16> to vector<8x64xbf16>
    %8 = vector.extract_strided_slice %7 {offsets = [0, 0], sizes = [8, 8], strides = [1, 1]} : vector<8x64xbf16> to vector<8x8xbf16>
    %9 = vector.extract_strided_slice %7 {offsets = [0, 8], sizes = [8, 8], strides = [1, 1]} : vector<8x64xbf16> to vector<8x8xbf16>
    %10 = vector.extract_strided_slice %7 {offsets = [0, 16], sizes = [8, 8], strides = [1, 1]} : vector<8x64xbf16> to vector<8x8xbf16>
    %11 = vector.extract_strided_slice %7 {offsets = [0, 24], sizes = [8, 8], strides = [1, 1]} : vector<8x64xbf16> to vector<8x8xbf16>
    %12 = vector.extract_strided_slice %7 {offsets = [0, 32], sizes = [8, 8], strides = [1, 1]} : vector<8x64xbf16> to vector<8x8xbf16>
    %13 = vector.extract_strided_slice %7 {offsets = [0, 40], sizes = [8, 8], strides = [1, 1]} : vector<8x64xbf16> to vector<8x8xbf16>
    %14 = vector.extract_strided_slice %7 {offsets = [0, 48], sizes = [8, 8], strides = [1, 1]} : vector<8x64xbf16> to vector<8x8xbf16>
    %15 = vector.extract_strided_slice %7 {offsets = [0, 56], sizes = [8, 8], strides = [1, 1]} : vector<8x64xbf16> to vector<8x8xbf16>
    %16 = vector.shape_cast %8 : vector<8x8xbf16> to vector<1x8x8xbf16>
    %17 = vector.shape_cast %9 : vector<8x8xbf16> to vector<1x8x8xbf16>
    %18 = vector.shape_cast %10 : vector<8x8xbf16> to vector<1x8x8xbf16>
    %19 = vector.shape_cast %11 : vector<8x8xbf16> to vector<1x8x8xbf16>
    %20 = vector.shape_cast %12 : vector<8x8xbf16> to vector<1x8x8xbf16>
    %21 = vector.shape_cast %13 : vector<8x8xbf16> to vector<1x8x8xbf16>
    %22 = vector.shape_cast %14 : vector<8x8xbf16> to vector<1x8x8xbf16>
    %23 = vector.shape_cast %15 : vector<8x8xbf16> to vector<1x8x8xbf16>
    %24 = tpu.concatenate %16, %17, %18, %19, %20, %21, %22, %23 in 0 : vector<1x8x8xbf16>, vector<1x8x8xbf16>, vector<1x8x8xbf16>, vector<1x8x8xbf16>, vector<1x8x8xbf16>, vector<1x8x8xbf16>, vector<1x8x8xbf16>, vector<1x8x8xbf16> -> vector<8x8x8xbf16>
    %25 = vector.extract_strided_slice %6 {offsets = [8, 0], sizes = [8, 64], strides = [1, 1]} : vector<16x64xbf16> to vector<8x64xbf16>
    %26 = vector.extract_strided_slice %25 {offsets = [0, 0], sizes = [8, 8], strides = [1, 1]} : vector<8x64xbf16> to vector<8x8xbf16>
    %27 = vector.extract_strided_slice %25 {offsets = [0, 8], sizes = [8, 8], strides = [1, 1]} : vector<8x64xbf16> to vector<8x8xbf16>
    %28 = vector.extract_strided_slice %25 {offsets = [0, 16], sizes = [8, 8], strides = [1, 1]} : vector<8x64xbf16> to vector<8x8xbf16>
    %29 = vector.extract_strided_slice %25 {offsets = [0, 24], sizes = [8, 8], strides = [1, 1]} : vector<8x64xbf16> to vector<8x8xbf16>
    %30 = vector.extract_strided_slice %25 {offsets = [0, 32], sizes = [8, 8], strides = [1, 1]} : vector<8x64xbf16> to vector<8x8xbf16>
    %31 = vector.extract_strided_slice %25 {offsets = [0, 40], sizes = [8, 8], strides = [1, 1]} : vector<8x64xbf16> to vector<8x8xbf16>
    %32 = vector.extract_strided_slice %25 {offsets = [0, 48], sizes = [8, 8], strides = [1, 1]} : vector<8x64xbf16> to vector<8x8xbf16>
    %33 = vector.extract_strided_slice %25 {offsets = [0, 56], sizes = [8, 8], strides = [1, 1]} : vector<8x64xbf16> to vector<8x8xbf16>
    %34 = vector.shape_cast %26 : vector<8x8xbf16> to vector<1x8x8xbf16>
    %35 = vector.shape_cast %27 : vector<8x8xbf16> to vector<1x8x8xbf16>
    %36 = vector.shape_cast %28 : vector<8x8xbf16> to vector<1x8x8xbf16>
    %37 = vector.shape_cast %29 : vector<8x8xbf16> to vector<1x8x8xbf16>
    %38 = vector.shape_cast %30 : vector<8x8xbf16> to vector<1x8x8xbf16>
    %39 = vector.shape_cast %31 : vector<8x8xbf16> to vector<1x8x8xbf16>
    %40 = vector.shape_cast %32 : vector<8x8xbf16> to vector<1x8x8xbf16>
    %41 = vector.shape_cast %33 : vector<8x8xbf16> to vector<1x8x8xbf16>
    %42 = tpu.concatenate %34, %35, %36, %37, %38, %39, %40, %41 in 0 : vector<1x8x8xbf16>, vector<1x8x8xbf16>, vector<1x8x8xbf16>, vector<1x8x8xbf16>, vector<1x8x8xbf16>, vector<1x8x8xbf16>, vector<1x8x8xbf16>, vector<1x8x8xbf16> -> vector<8x8x8xbf16>
    %c0_5 = arith.constant 0 : index
    %c0_6 = arith.constant 0 : index
    %c0_7 = arith.constant 0 : index
    %43 = vector.load %arg1[%c0_5, %c0_6, %c0_7] : memref<8x8x8xf32, #tpu.memory_space<vmem>>, vector<8x8x8xf32>
    %cst_8 = arith.constant 0.353553385 : f32
    %44 = vector.broadcast %cst_8 : f32 to vector<8x8x8xf32>
    %45 = arith.mulf %43, %44 : vector<8x8x8xf32>
    %46 = arith.truncf %45 : vector<8x8x8xf32> to vector<8x8x8xbf16>
    "tpu.trace_start"() <{level = 10 : i32, message = "hqd,hkd->hqk"}> : () -> ()
    %cst_9 = arith.constant dense<0.000000e+00> : vector<8x8x8xf32>
    %47 = tpu.matmul %46, %24, %cst_9 {dimension_numbers = #tpu.dot_dimension_numbers<[2], [2], [1], [1], [0, 0, 0, 1, 1, 1], [0], [0]>} : vector<8x8x8xbf16>, vector<8x8x8xbf16>, vector<8x8x8xf32> -> vector<8x8x8xf32>
    "tpu.trace_stop"() : () -> ()
    %cst_10 = arith.constant dense<0xFF800000> : vector<8x8xf32>
    %48 = vector.multi_reduction <maximumf>, %47, %cst_10 [2] : vector<8x8x8xf32> to vector<8x8xf32>
    %49 = vector.shape_cast %48 : vector<8x8xf32> to vector<8x8x1xf32>
    %50 = vector.broadcast %49 : vector<8x8x1xf32> to vector<8x8x8xf32>
    %51 = arith.subf %47, %50 : vector<8x8x8xf32>
    %52 = math.exp %51 : vector<8x8x8xf32>
    %cst_11 = arith.constant dense<0.000000e+00> : vector<8x8xf32>
    %53 = vector.multi_reduction <add>, %52, %cst_11 [2] : vector<8x8x8xf32> to vector<8x8xf32>
    %54 = vector.shape_cast %53 : vector<8x8xf32> to vector<8x8x1xf32>
    %55 = tpu.reciprocal %54 : vector<8x8x1xf32> -> vector<8x8x1xf32>
    %56 = vector.broadcast %55 : vector<8x8x1xf32> to vector<8x8x8xf32>
    %57 = arith.mulf %52, %56 : vector<8x8x8xf32>
    %58 = arith.truncf %57 : vector<8x8x8xf32> to vector<8x8x8xbf16>
    "tpu.trace_start"() <{level = 10 : i32, message = "hqk,hkd->hqd"}> : () -> ()
    %cst_12 = arith.constant dense<0.000000e+00> : vector<8x8x8xf32>
    %59 = tpu.matmul %58, %42, %cst_12 {dimension_numbers = #tpu.dot_dimension_numbers<[2], [1], [1], [2], [0, 0, 0, 1, 1, 2], [0], [0]>} : vector<8x8x8xbf16>, vector<8x8x8xbf16>, vector<8x8x8xf32> -> vector<8x8x8xf32>
    "tpu.trace_stop"() : () -> ()
    %60 = vector.extract_strided_slice %59 {offsets = [0, 0, 0], sizes = [1, 8, 8], strides = [1, 1, 1]} : vector<8x8x8xf32> to vector<1x8x8xf32>
    %61 = vector.shape_cast %60 : vector<1x8x8xf32> to vector<8x8xf32>
    %62 = vector.extract_strided_slice %59 {offsets = [1, 0, 0], sizes = [1, 8, 8], strides = [1, 1, 1]} : vector<8x8x8xf32> to vector<1x8x8xf32>
    %63 = vector.shape_cast %62 : vector<1x8x8xf32> to vector<8x8xf32>
    %64 = vector.extract_strided_slice %59 {offsets = [2, 0, 0], sizes = [1, 8, 8], strides = [1, 1, 1]} : vector<8x8x8xf32> to vector<1x8x8xf32>
    %65 = vector.shape_cast %64 : vector<1x8x8xf32> to vector<8x8xf32>
    %66 = vector.extract_strided_slice %59 {offsets = [3, 0, 0], sizes = [1, 8, 8], strides = [1, 1, 1]} : vector<8x8x8xf32> to vector<1x8x8xf32>
    %67 = vector.shape_cast %66 : vector<1x8x8xf32> to vector<8x8xf32>
    %68 = tpu.concatenate %61, %63, %65, %67 in 1 : vector<8x8xf32>, vector<8x8xf32>, vector<8x8xf32>, vector<8x8xf32> -> vector<8x32xf32>
    %69 = vector.extract_strided_slice %59 {offsets = [4, 0, 0], sizes = [1, 8, 8], strides = [1, 1, 1]} : vector<8x8x8xf32> to vector<1x8x8xf32>
    %70 = vector.shape_cast %69 : vector<1x8x8xf32> to vector<8x8xf32>
    %71 = vector.extract_strided_slice %59 {offsets = [5, 0, 0], sizes = [1, 8, 8], strides = [1, 1, 1]} : vector<8x8x8xf32> to vector<1x8x8xf32>
    %72 = vector.shape_cast %71 : vector<1x8x8xf32> to vector<8x8xf32>
    %73 = vector.extract_strided_slice %59 {offsets = [6, 0, 0], sizes = [1, 8, 8], strides = [1, 1, 1]} : vector<8x8x8xf32> to vector<1x8x8xf32>
    %74 = vector.shape_cast %73 : vector<1x8x8xf32> to vector<8x8xf32>
    %75 = vector.extract_strided_slice %59 {offsets = [7, 0, 0], sizes = [1, 8, 8], strides = [1, 1, 1]} : vector<8x8x8xf32> to vector<1x8x8xf32>
    %76 = vector.shape_cast %75 : vector<1x8x8xf32> to vector<8x8xf32>
    %77 = tpu.concatenate %70, %72, %74, %76 in 1 : vector<8x8xf32>, vector<8x8xf32>, vector<8x8xf32>, vector<8x8xf32> -> vector<8x32xf32>
    %78 = tpu.concatenate %68, %77 in 0 : vector<8x32xf32>, vector<8x32xf32> -> vector<16x32xf32>
    %79 = arith.truncf %78 : vector<16x32xf32> to vector<16x32xbf16>
    %c0_13 = arith.constant 0 : index
    %c0_14 = arith.constant 0 : index
    %80 = vector.load %arg5[%c0_13, %c0_14] : memref<32x32xbf16, #tpu.memory_space<vmem>>, vector<32x32xbf16>
    %cst_15 = arith.constant dense<0.000000e+00> : vector<16x32xf32>
    %81 = tpu.matmul %79, %80, %cst_15 {dimension_numbers = #tpu.dot_dimension_numbers<[1], [0], [0], [1], [0, 0, 1, 1], [], []>} : vector<16x32xbf16>, vector<32x32xbf16>, vector<16x32xf32> -> vector<16x32xf32>
    %c0_16 = arith.constant 0 : index
    %c0_17 = arith.constant 0 : index
    %82 = vector.load %arg6[%c0_16, %c0_17] : memref<1x32xf32, #tpu.memory_space<vmem>>, vector<1x32xf32>
    %83 = vector.broadcast %82 : vector<1x32xf32> to vector<16x32xf32>
    %84 = arith.addf %81, %83 : vector<16x32xf32>
    %85 = vector.extract_strided_slice %84 {offsets = [0, 0], sizes = [1, 32], strides = [1, 1]} : vector<16x32xf32> to vector<1x32xf32>
    %86 = vector.extract_strided_slice %84 {offsets = [1, 0], sizes = [1, 32], strides = [1, 1]} : vector<16x32xf32> to vector<1x32xf32>
    %87 = vector.extract_strided_slice %84 {offsets = [2, 0], sizes = [1, 32], strides = [1, 1]} : vector<16x32xf32> to vector<1x32xf32>
    %88 = vector.extract_strided_slice %84 {offsets = [3, 0], sizes = [1, 32], strides = [1, 1]} : vector<16x32xf32> to vector<1x32xf32>
    %89 = vector.extract_strided_slice %84 {offsets = [4, 0], sizes = [1, 32], strides = [1, 1]} : vector<16x32xf32> to vector<1x32xf32>
    %90 = vector.extract_strided_slice %84 {offsets = [5, 0], sizes = [1, 32], strides = [1, 1]} : vector<16x32xf32> to vector<1x32xf32>
    %91 = vector.extract_strided_slice %84 {offsets = [6, 0], sizes = [1, 32], strides = [1, 1]} : vector<16x32xf32> to vector<1x32xf32>
    %92 = vector.extract_strided_slice %84 {offsets = [7, 0], sizes = [1, 32], strides = [1, 1]} : vector<16x32xf32> to vector<1x32xf32>
    %93 = tpu.concatenate %85, %86, %87, %88, %89, %90, %91, %92 in 1 : vector<1x32xf32>, vector<1x32xf32>, vector<1x32xf32>, vector<1x32xf32>, vector<1x32xf32>, vector<1x32xf32>, vector<1x32xf32>, vector<1x32xf32> -> vector<1x256xf32>
    %94 = vector.extract_strided_slice %84 {offsets = [8, 0], sizes = [1, 32], strides = [1, 1]} : vector<16x32xf32> to vector<1x32xf32>
    %95 = vector.extract_strided_slice %84 {offsets = [9, 0], sizes = [1, 32], strides = [1, 1]} : vector<16x32xf32> to vector<1x32xf32>
    %96 = vector.extract_strided_slice %84 {offsets = [10, 0], sizes = [1, 32], strides = [1, 1]} : vector<16x32xf32> to vector<1x32xf32>
    %97 = vector.extract_strided_slice %84 {offsets = [11, 0], sizes = [1, 32], strides = [1, 1]} : vector<16x32xf32> to vector<1x32xf32>
    %98 = vector.extract_strided_slice %84 {offsets = [12, 0], sizes = [1, 32], strides = [1, 1]} : vector<16x32xf32> to vector<1x32xf32>
    %99 = vector.extract_strided_slice %84 {offsets = [13, 0], sizes = [1, 32], strides = [1, 1]} : vector<16x32xf32> to vector<1x32xf32>
    %100 = vector.extract_strided_slice %84 {offsets = [14, 0], sizes = [1, 32], strides = [1, 1]} : vector<16x32xf32> to vector<1x32xf32>
    %101 = vector.extract_strided_slice %84 {offsets = [15, 0], sizes = [1, 32], strides = [1, 1]} : vector<16x32xf32> to vector<1x32xf32>
    %102 = tpu.concatenate %94, %95, %96, %97, %98, %99, %100, %101 in 1 : vector<1x32xf32>, vector<1x32xf32>, vector<1x32xf32>, vector<1x32xf32>, vector<1x32xf32>, vector<1x32xf32>, vector<1x32xf32>, vector<1x32xf32> -> vector<1x256xf32>
    %103 = tpu.concatenate %93, %102 in 0 : vector<1x256xf32>, vector<1x256xf32> -> vector<2x256xf32>
    %c0_18 = arith.constant 0 : index
    %c0_19 = arith.constant 0 : index
    %104 = vector.load %arg7[%c0_18, %c0_19] : memref<2x256xf32, #tpu.memory_space<vmem>>, vector<2x256xf32>
    tpu.vector_store %arg7[%c0_18, %c0_19], %103 {strides = array<i32>} : memref<2x256xf32, #tpu.memory_space<vmem>>, vector<2x256xf32>,
    return
  }
  func.func @transform_0(%arg0: i32) -> (i32, i32, i32) {
    %c0_i32 = arith.constant 0 : i32
    %c0_i32_0 = arith.constant 0 : i32
    %c0_i32_1 = arith.constant 0 : i32
    %c0_i32_2 = arith.constant 0 : i32
    return %c0_i32, %c0_i32_0, %c0_i32_1 : i32, i32, i32
  }
  func.func @transform_1(%arg0: i32) -> (i32, i32) {
    %c0_i32 = arith.constant 0 : i32
    %c0_i32_0 = arith.constant 0 : i32
    %c0_i32_1 = arith.constant 0 : i32
    return %c0_i32, %c0_i32_0 : i32, i32
  }
  func.func @transform_2(%arg0: i32) -> (i32, i32) {
    %c0_i32 = arith.constant 0 : i32
    %c0_i32_0 = arith.constant 0 : i32
    %c0_i32_1 = arith.constant 0 : i32
    return %c0_i32, %c0_i32_0 : i32, i32
  }
  func.func @transform_3(%arg0: i32) -> (i32, i32) {
    %c0_i32 = arith.constant 0 : i32
    %c0_i32_0 = arith.constant 0 : i32
    %c0_i32_1 = arith.constant 0 : i32
    return %c0_i32, %c0_i32_0 : i32, i32
  }
  func.func @transform_4(%arg0: i32) -> (i32, i32) {
    %c0_i32 = arith.constant 0 : i32
    %c0_i32_0 = arith.constant 0 : i32
    %c0_i32_1 = arith.constant 0 : i32
    return %c0_i32, %c0_i32_0 : i32, i32
  }
  func.func @transform_5(%arg0: i32) -> (i32, i32) {
    %c0_i32 = arith.constant 0 : i32
    %c0_i32_0 = arith.constant 0 : i32
    %c0_i32_1 = arith.constant 0 : i32
    return %c0_i32, %c0_i32_0 : i32, i32
  }
  func.func @transform_6(%arg0: i32) -> (i32, i32) {
    %c0_i32 = arith.constant 0 : i32
    %c0_i32_0 = arith.constant 0 : i32
    %c0_i32_1 = arith.constant 0 : i32
    return %c0_i32, %c0_i32_0 : i32, i32
  }
}

</mosaic_0001>

<bundles_post_ra>
// kernel: tpu_custom_call.1
= control target key start
LH: loop header
LB: loop body
LE: loop exit
PB: predicated region body
PF: predicated region fallthrough
CT: control target
= control target key end

     0   :  { %v1009_v1 = vmov 0   ;;  %s1283_s0 = inlined_call_operand.vmem [shape: f32[8,8,8], index: 0, kind: input, shape index: {}]   ;;  %s1284_s1 = inlined_call_operand.vmem [shape: bf16[112,64], index: 1, kind: input, shape index: {}]   ;;  %s1285_s2 = inlined_call_operand.vmem [shape: bf16[16,112], index: 2, kind: input, shape index: {}]   ;;  %s1286_s3 = inlined_call_operand.vmem [shape: f32[16,1], index: 3, kind: input, shape index: {}]   ;;  %s1287_s4 = inlined_call_operand.vmem [shape: bf16[32,32], index: 4, kind: input, shape index: {}]   ;;  %s1288_s5 = inlined_call_operand.vmem [shape: f32[1,32], index: 5, kind: input, shape index: {}]   ;;  %s1289_s6 = inlined_call_operand.hbm [shape: f32[2,256], index: 6, kind: output, shape index: {}]  }
   0x1   :  { %v916_v0 = vld [vmem:[%s1284_s1 + $0x30] sm:$0xff]  ;;  %933 = vset.pattern.permute.xlu0 %v1009_v1  ;;  %934 = vset.pattern.permute.xlu1 %v1009_v1  ;;  %v915_v2 = vld [vmem:[%s1284_s1 + $0x28] sm:$0xff]  ;;  %v41_v3 = vld [vmem:[%s1286_s3] sm:$0xff] }
   0x2   :  { %105 = vmatpush.bf16.msra.mxu0 %v916_v0  ;;  %45 = vperm.xlu0 %933, %v41_v3  }
   0x3   :  { %11 = vsyncpa [#allocation3], 0  ;;  %v914_v4 = vld [vmem:[%s1284_s1 + $0x20] sm:$0xff]  ;;  %v913_v5 = vld [vmem:[%s1284_s1 + $0x18] sm:$0xff]  ;;  %vm100_vm0 = vcmask 916480   ;;  %vm174_vm1 = vcmask 64512  }
   0x4   :  { %v912_v6 = vld [vmem:[%s1284_s1 + $0x10] sm:$0xff]  ;;  %v911_v7 = vld [vmem:[%s1284_s1 + $0x8] sm:$0xff]  ;;  %v910_v8 = vld [vmem:[%s1284_s1] sm:$0xff]  ;;  %s1010_s17 = smov 104   ;;  %s1011_s1 = smov 96   ;;  %vm530_vm2 = vcmask 1043456  }
   0x5   :  { %v909_v9 = vld [vmem:[%s1285_s2] sm:$0xff]  ;;  %s1012_s2 = smov 120   ;;  %s1013_s18 = smov 72   ;;  %v153_v18 = vld [vmem:[%s1283_s0 + $0x18] sm:$0xff]  ;;  %v151_v23 = vld [vmem:[%s1283_s0 + $0x8] sm:$0xff] }
   0x6   :  { %106 = vmatpush.bf16.msra.mxu0 %v915_v2  ;;  %v150_v14 = vld [vmem:[%s1283_s0] sm:$0xff]  ;;  %s1014_s19 = smov 112   ;;  %s1015_s20 = smov 88   ;;  %v161_v21 = vmul.f32 0.35355338, %v153_v18  ;;  %v152_v30 = vld [vmem:[%s1283_s0 + $0x10] sm:$0xff] }
   0x7   :  { %v158_v16 = vmul.f32 0.35355338, %v150_v14  ;;  %s1016_s21 = smov 80   ;;  %v159_v28 = vmul.f32 0.35355338, %v151_v23  ;;  %v156_v39 = vld [vmem:[%s1283_s0 + $0x30] sm:$0xff] }
   0x8   :  { %v169_v22 = vpack.c.bf16 %v161_v21, %v161_v21  ;;  %v160_v35 = vmul.f32 0.35355338, %v152_v30  ;;  %v154_v40 = vld [vmem:[%s1283_s0 + $0x20] sm:$0xff]  ;;  %v164_v43 = vmul.f32 0.35355338, %v156_v39  ;;  %v155_v48 = vld [vmem:[%s1283_s0 + $0x28] sm:$0xff] }
   0x9   :  { %v166_v17 = vpack.c.bf16 %v158_v16, %v158_v16  ;;  %v167_v29 = vpack.c.bf16 %v159_v28, %v159_v28  ;;  %v162_v44 = vmul.f32 0.35355338, %v154_v40  ;;  %v163_v49 = vmul.f32 0.35355338, %v155_v48  ;;  %v157_v52 = vld [vmem:[%s1283_s0 + $0x38] sm:$0xff]  ;;  %s1018_s13 = smov 8  }
   0xa   :  { %107 = vmatpush.bf16.msra.mxu0 %v914_v4  ;;  %v168_v38 = vpack.c.bf16 %v160_v35, %v160_v35  ;;  %v172_v46 = vpack.c.bf16 %v164_v43, %v164_v43  ;;  %v165_v53 = vmul.f32 0.35355338, %v157_v52  ;;  %s1019_s14 = smov 24   ;;  %s842_s23 = sshll.u32 %s1289_s6, 4  ;;  %s843_s23 = int_to_ptr.hbm [resolvable:$true] %s842_s23 }
   0xb   :  { %v170_v47 = vpack.c.bf16 %v162_v44, %v162_v44  ;;  %v171_v51 = vpack.c.bf16 %v163_v49, %v163_v49 }
   0xc   :  { %v173_v54 = vpack.c.bf16 %v165_v53, %v165_v53 }
   0xe   :  { %108 = vmatpush.bf16.msra.mxu0 %v913_v5 }
  0x12   :  { %109 = vmatpush.bf16.msra.mxu0 %v912_v6 }
  0x16   :  { %110 = vmatpush.bf16.msra.mxu0 %v911_v7 }
  0x1a   :  { %111 = vmatpush.bf16.msra.mxu0 %v910_v8 }
  0x1d   :  { %883 = vmatmul.msk.bf16.vlgmr.msra.gmra.mxu0 %vm100_vm0, %v909_v9  ;;  %v42_v9 = vld [vmem:[%s1286_s3 + $0x8] sm:$0xff]  ;;  %s1017_s3 = smov 16  }
  0x74   :  { %v46_v10 = vpop.permute.xlu0 %45 }
  0x9a   :  { %v113_v11 = vpop.f32.mrf.mxu0 }
  0x9b   :  { %v114_v12 = vadd.f32 %v113_v11, %v46_v10 }
  0x9d   :  { %v118_v13 = vpack.c.bf16 %v114_v12, %v114_v12 }
  0x9f   :  { %125 = vrot.lane.b32.xlu2 %v118_v13, %s1010_s17  ;;  %127 = vrot.lane.b32.xlu1 %v118_v13, %s1011_s1  ;;  %v179_v15 = vsel %vm174_vm1, %v118_v13, 0 }
  0xa0   :  { %121 = vrot.lane.b32.xlu0 %v118_v13, %s1012_s2  ;;  %188 = vmatpush.bf16.xpose.msra.mxu1 %v179_v15 }
  0xa2   :  { %v115_v15 = vpop.f32.mrf.mxu0 }
  0xa7   :  { %133 = vrot.lane.b32.xlu2 %v118_v13, %s1013_s18  ;;  %123 = vrot.lane.b32.xlu1 %v118_v13, %s1014_s19 }
  0xa8   :  { %129 = vrot.lane.b32.xlu0 %v118_v13, %s1015_s20  ;;  %884 = vmatmul.msk.bf16.vlgmr.msra.gmra.mxu1 %vm174_vm1, %v166_v17 }
  0xaf   :  { %131 = vrot.lane.b32.xlu1 %v118_v13, %s1016_s21 }
  0xf9   :  { %v126_v19 = vpop.permute.xlu2 %125 }
  0xfa   :  { %v236_v20 = vsel %vm174_vm1, %v126_v19, 0 }
  0xfb   :  { %245 = vmatpush.bf16.xpose.msrb.mxu1 %v236_v20 }
 0x101   :  { %v134_v31 = vpop.permute.xlu2 %133 }
 0x102   :  { %887 = vmatmul.msk.bf16.vlgmr.msrb.gmra.mxu1 %vm174_vm1, %v169_v22  ;;  %v312_v36 = vsel %vm174_vm1, %v134_v31, 0 }
 0x111   :  { %v128_v24 = vpop.permute.xlu1 %127 }
 0x112   :  { %v122_v25 = vpop.permute.xlu0 %121  ;;  %v255_v26 = vsel %vm174_vm1, %v128_v24, 0 }
 0x113   :  { %v198_v27 = vsel %vm174_vm1, %v122_v25, 0 }
 0x114   :  { %207 = vmatpush.bf16.xpose.msra.mxu2 %v198_v27 }
 0x119   :  { %v124_v32 = vpop.permute.xlu1 %123 }
 0x11a   :  { %v130_v33 = vpop.permute.xlu0 %129  ;;  %v217_v34 = vsel %vm174_vm1, %v124_v32, 0 }
 0x11b   :  { %885 = vmatmul.msk.bf16.vlgmr.msra.gmra.mxu2 %vm174_vm1, %v167_v29  ;;  %226 = vmatpush.bf16.xpose.msra.mxu3 %v217_v34  ;;  %v274_v37 = vsel %vm174_vm1, %v130_v33, 0 }
 0x11c   :  { %264 = vmatpush.bf16.xpose.msrb.mxu2 %v255_v26 }
 0x121   :  { %v132_v41 = vpop.permute.xlu1 %131 }
 0x122   :  { %v293_v42 = vsel %vm174_vm1, %v132_v41, 0  ;;  %886 = vmatmul.msk.bf16.vlgmr.msra.gmra.mxu3 %vm174_vm1, %v168_v38 }
 0x123   :  { %283 = vmatpush.bf16.xpose.msrb.mxu3 %v274_v37  ;;  %302 = vmatpush.bf16.xpose.msra.mxu1 %v293_v42 }
 0x124   :  { %321 = vmatpush.bf16.xpose.msra.mxu2 %v312_v36 }
 0x125   :  { %v1122_v45 = vpop.f32.mrf.mxu1 }
 0x126   :  { %v327_v57 = vsel %vm174_vm1, %v1122_v45, -inf }
 0x12a   :  { %890 = vmatmul.msk.bf16.vlgmr.msra.gmra.mxu1 %vm174_vm1, %v172_v46 }
 0x12b   :  { %888 = vmatmul.msk.bf16.vlgmr.msrb.gmra.mxu2 %vm174_vm1, %v170_v47 }
 0x12d   :  { %v192_v50 = vpop.f32.mrf.mxu1 }
 0x132   :  { %889 = vmatmul.msk.bf16.vlgmr.msrb.gmra.mxu3 %vm174_vm1, %v171_v51 }
 0x13b   :  { %891 = vmatmul.msk.bf16.vlgmr.msra.gmra.mxu2 %vm174_vm1, %v173_v54 }
 0x17f   :  { %v247_v55 = vpop.f32.mrf.mxu1 }
 0x180   :  { %v336_v56 = vsel %vm174_vm1, %v247_v55, -inf }
 0x181   :  { %337 = vmax.xlane.f32.xlu2 %v336_v56 }
 0x187   :  { %v249_v58 = vpop.f32.mrf.mxu1 }
 0x189   :  { %328 = vmax.xlane.f32.xlu2 %v327_v57 }
 0x19e   :  { %v209_v59 = vpop.f32.mrf.mxu2 }
 0x19f   :  { %v330_v60 = vsel %vm174_vm1, %v209_v59, -inf }
 0x1a0   :  { %331 = vmax.xlane.f32.xlu0 %v330_v60 }
 0x1a5   :  { %v228_v61 = vpop.f32.mrf.mxu3 }
 0x1a6   :  { %v333_v62 = vsel %vm174_vm1, %v228_v61, -inf  ;;  %v211_v63 = vpop.f32.mrf.mxu2 }
 0x1a7   :  { %334 = vmax.xlane.f32.xlu1 %v333_v62  ;;  %v304_v0 = vpop.f32.mrf.mxu1 }
 0x1a8   :  { %v345_v1 = vsel %vm174_vm1, %v304_v0, -inf }
 0x1a9   :  { %346 = vmax.xlane.f32.xlu0 %v345_v1 }
 0x1ad   :  { %v230_v2 = vpop.f32.mrf.mxu3 }
 0x1ae   :  { %v1140_v3 = vpop.f32.mrf.mxu2 }
 0x1af   :  { %v306_v4 = vpop.f32.mrf.mxu1  ;;  %v339_v8 = vsel %vm174_vm1, %v1140_v3, -inf }
 0x1b5   :  { %v285_v5 = vpop.f32.mrf.mxu3 }
 0x1b6   :  { %v342_v6 = vsel %vm174_vm1, %v285_v5, -inf  ;;  %v268_v7 = vpop.f32.mrf.mxu2 }
 0x1b7   :  { %343 = vmax.xlane.f32.xlu2 %v342_v6 }
 0x1bd   :  { %v287_v10 = vpop.f32.mrf.mxu3 }
 0x1be   :  { %v323_v11 = vpop.f32.mrf.mxu2 }
 0x1bf   :  { %340 = vmax.xlane.f32.xlu2 %v339_v8  ;;  %v348_v12 = vsel %vm174_vm1, %v323_v11, -inf }
 0x1c0   :  { %50 = vperm.xlu1 %934, %v42_v9  }
 0x1c6   :  { %v325_v13 = vpop.f32.mrf.mxu2 }
 0x1c7   :  { %349 = vmax.xlane.f32.xlu2 %v348_v12 }
 0x1f4   :  { %v338_v20 = vpop.xlane.xlu2 %337 }
 0x1f5   :  { %v354_v23 = vsub.f32 %v247_v55, %v338_v20 }
 0x1f7   :  { %v365_v26 = vmul.f32 1.442695, %v354_v23 }
 0x1fc   :  { %v329_v21 = vpop.xlane.xlu2 %328 }
 0x1fd   :  { %v351_v29 = vsub.f32 %v1122_v45, %v329_v21 }
 0x1ff   :  { %v359_v32 = vmul.f32 1.442695, %v351_v29 }
 0x213   :  { %v332_v27 = vpop.xlane.xlu0 %331 }
 0x214   :  { %v352_v30 = vsub.f32 %v209_v59, %v332_v27 }
 0x216   :  { %v361_v35 = vmul.f32 1.442695, %v352_v30 }
 0x21a   :  { %v335_v14 = vpop.xlane.xlu1 %334 }
 0x21b   :  { %v353_v22 = vsub.f32 %v228_v61, %v335_v14 }
 0x21c   :  { %v347_v36 = vpop.xlane.xlu0 %346 }
 0x21d   :  { %v363_v25 = vmul.f32 1.442695, %v353_v22  ;;  %v357_v39 = vsub.f32 %v304_v0, %v347_v36 }
 0x21f   :  { %951 = vpow2.f32 %v363_v25  ;;  %v371_v42 = vmul.f32 1.442695, %v357_v39 }
 0x220   :  { %953 = vpow2.f32 %v365_v26 }
 0x225   :  { %v1155_v34 = vpop.eup %951 }
 0x226   :  { %v1157_v37 = vpop.eup %953  ;;  %v381_v38 = vsel %vm174_vm1, %v1155_v34, 0.0 }
 0x227   :  { %v384_v40 = vsel %vm174_vm1, %v1157_v37, 0.0 }
 0x22a   :  { %v344_v24 = vpop.xlane.xlu2 %343 }
 0x22b   :  { %v356_v28 = vsub.f32 %v285_v5, %v344_v24 }
 0x22d   :  { %v369_v31 = vmul.f32 1.442695, %v356_v28 }
 0x22f   :  { %955 = vpow2.f32 %v369_v31 }
 0x230   :  { %957 = vpow2.f32 %v359_v32 }
 0x231   :  { %959 = vpow2.f32 %v361_v35 }
 0x232   :  { %v51_v16 = vpop.permute.xlu1 %50  ;;  %v341_v33 = vpop.xlane.xlu2 %340  ;;  %961 = vpow2.f32 %v371_v42 }
 0x233   :  { %v116_v17 = vadd.f32 %v115_v15, %v51_v16  ;;  %v355_v57 = vsub.f32 %v1140_v3, %v341_v33 }
 0x235   :  { %v119_v18 = vpack.c.bf16 %v116_v17, %v116_v17  ;;  %v1163_v41 = vpop.eup %955  ;;  %v367_v59 = vmul.f32 1.442695, %v355_v57 }
 0x236   :  { %v1165_v43 = vpop.eup %957  ;;  %v390_v46 = vsel %vm174_vm1, %v1163_v41, 0.0 }
 0x237   :  { %140 = vrot.lane.b32.xlu1 %v119_v18, %s1010_s17  ;;  %138 = vrot.lane.b32.xlu2 %v119_v18, %s1014_s19  ;;  %v532_v19 = vsel %vm530_vm2, %v119_v18, 0  ;;  %v1167_v45 = vpop.eup %959  ;;  %v375_v48 = vsel %vm174_vm1, %v1165_v43, 0.0  ;;  %s1020_s19 = smov 32  }
 0x238   :  { %148 = vrot.lane.b32.xlu0 %v119_v18, %s1013_s18  ;;  %541 = vmatpush.bf16.msra.mxu3 %v532_v19  ;;  %v378_v49 = vsel %vm174_vm1, %v1167_v45, 0.0  ;;  %v1175_v51 = vpop.eup %961 }
 0x239   :  { %v393_v52 = vsel %vm174_vm1, %v1175_v51, 0.0 }
 0x23a   :  { %v350_v44 = vpop.xlane.xlu2 %349 }
 0x23b   :  { %v358_v47 = vsub.f32 %v323_v11, %v350_v44 }
 0x23d   :  { %v373_v50 = vmul.f32 1.442695, %v358_v47 }
 0x23f   :  { %136 = vrot.lane.b32.xlu1 %v119_v18, %s1012_s2  ;;  %963 = vpow2.f32 %v373_v50 }
 0x240   :  { %965 = vpow2.f32 %v367_v59 }
 0x245   :  { %v1179_v53 = vpop.eup %963 }
 0x246   :  { %v396_v54 = vsel %vm174_vm1, %v1179_v53, 0.0  ;;  %v1191_v1 = vpop.eup %965 }
 0x247   :  { %v387_v2 = vsel %vm174_vm1, %v1191_v1, 0.0 }
 0x260   :  { %382 = vadd.xlane.f32.xlu2 %v381_v38 }
 0x262   :  { %385 = vadd.xlane.f32.xlu0 %v384_v40 }
 0x268   :  { %391 = vadd.xlane.f32.xlu2 %v390_v46 }
 0x269   :  { %376 = vadd.xlane.f32.xlu1 %v375_v48 }
 0x26a   :  { %379 = vadd.xlane.f32.xlu0 %v378_v49 }
 0x272   :  { %394 = vadd.xlane.f32.xlu0 %v393_v52 }
 0x27a   :  { %397 = vadd.xlane.f32.xlu0 %v396_v54 }
 0x280   :  { %146 = vrot.lane.b32.xlu2 %v119_v18, %s1016_s21 }
 0x288   :  { %142 = vrot.lane.b32.xlu2 %v119_v18, %s1011_s1 }
 0x28e   :  { %144 = vrot.lane.b32.xlu0 %v119_v18, %s1015_s20  ;;  %s1021_s20 = smov 64  }
 0x291   :  { %v139_v55 = vpop.permute.xlu2 %138 }
 0x292   :  { %v570_v56 = vsel %vm530_vm2, %v139_v55, 0 }
 0x293   :  { %579 = vmatpush.bf16.msrb.mxu1 %v570_v56 }
 0x2a9   :  { %v141_v58 = vpop.permute.xlu1 %140 }
 0x2aa   :  { %v589_v60 = vsel %vm530_vm2, %v141_v58, 0  ;;  %v149_v61 = vpop.permute.xlu0 %148 }
 0x2ab   :  { %v665_v62 = vsel %vm530_vm2, %v149_v61, 0  ;;  %598 = vmatpush.bf16.msrb.mxu2 %v589_v60 }
 0x2af   :  { %674 = vmatpush.bf16.msra.mxu2 %v665_v62 }
 0x2b1   :  { %v137_v63 = vpop.permute.xlu1 %136 }
 0x2b2   :  { %v551_v0 = vsel %vm530_vm2, %v137_v63, 0 }
 0x2b3   :  { %560 = vmatpush.bf16.msrb.mxu0 %v551_v0 }
 0x2b8   :  { %388 = vadd.xlane.f32.xlu0 %v387_v2 }
 0x2d3   :  { %v383_v3 = vpop.xlane.xlu2 %382 }
 0x2d4   :  { %967 = vrcp.f32 %v383_v3  ;;  %v436_v13 = vand.u32 2147483647, %v383_v3  ;;  %v438_v14 = vand.u32 2147483648, %v383_v3  ;;  %vm432_vm4 = vweird.f32 %v383_v3 }
 0x2d5   :  { %v386_v4 = vpop.xlane.xlu0 %385 }
 0x2d6   :  { %969 = vrcp.f32 %v386_v4  ;;  %v452_v17 = vand.u32 2147483648, %v386_v4  ;;  %v450_v20 = vand.u32 2147483647, %v386_v4  ;;  %v439_v21 = vor.u32 1.1754944e-38, %v438_v14 }
 0x2d7   :  { %vm437_vm7 = vcmp.eq.f32.partialorder %v436_v13, 8.507059e+37  ;;  %vm446_vm8 = vweird.f32 %v386_v4 }
 0x2d8   :  { %v453_v27 = vor.u32 1.1754944e-38, %v452_v17  ;;  %vm451_vm10 = vcmp.eq.f32.partialorder %v450_v20, 8.507059e+37 }
 0x2da   :  { %v968_v5 = vpop.eup %967 }
 0x2db   :  { %v428_v6 = vmul.f32 %v968_v5, %v383_v3  ;;  %v1195_v7 = vpop.xlane.xlu2 %391  ;;  %vm433_vm3 = vweird.f32 %v968_v5 }
 0x2dc   :  { %v970_v8 = vpop.eup %969  ;;  %v1197_v9 = vpop.xlane.xlu1 %376  ;;  %vm434_vm6 = vmor %vm432_vm4, %vm433_vm3  ;;  %v478_v20 = vand.u32 2147483647, %v1195_v7 }
 0x2dd   :  { %v429_v10 = vsub.f32 1.0, %v428_v6  ;;  %v442_v11 = vmul.f32 %v970_v8, %v386_v4  ;;  %971 = vrcp.f32 %v1197_v9  ;;  %v1200_v12 = vpop.xlane.xlu0 %379  ;;  %vm447_vm5 = vweird.f32 %v970_v8 }
 0x2de   :  { %973 = vrcp.f32 %v1200_v12  ;;  %vm448_vm9 = vmor %vm446_vm8, %vm447_vm5  ;;  %v410_v42 = vand.u32 2147483648, %v1197_v9  ;;  %vm404_vm12 = vweird.f32 %v1197_v9  ;;  %v422_v55 = vand.u32 2147483647, %v1200_v12 }
 0x2df   :  { %v430_v15 = vmul.f32 %v968_v5, %v429_v10  ;;  %v443_v16 = vsub.f32 1.0, %v442_v11  ;;  %975 = vrcp.f32 %v1195_v7  ;;  %vm418_vm0 = vweird.f32 %v1200_v12 }
 0x2e0   :  { %v411_v54 = vor.u32 1.1754944e-38, %v410_v42  ;;  %vm423_vm4 = vcmp.eq.f32.partialorder %v422_v55, 8.507059e+37 }
 0x2e1   :  { %v431_v18 = vadd.f32 %v968_v5, %v430_v15  ;;  %v444_v19 = vmul.f32 %v970_v8, %v443_v16 }
 0x2e3   :  { %v972_v22 = vpop.eup %971  ;;  %v435_v23 = vsel %vm434_vm6, %v968_v5, %v431_v18  ;;  %v445_v24 = vadd.f32 %v970_v8, %v444_v19  ;;  %v147_v25 = vpop.permute.xlu2 %146 }
 0x2e4   :  { %v440_v26 = vsel %vm437_vm7, %v439_v21, %v435_v23  ;;  %v400_v28 = vmul.f32 %v972_v22, %v1197_v9  ;;  %v646_v29 = vsel %vm530_vm2, %v147_v25, 0  ;;  %v974_v30 = vpop.eup %973  ;;  %vm405_vm11 = vweird.f32 %v972_v22 }
 0x2e5   :  { %v513_v31 = vmul.f32 %v1155_v34, %v440_v26  ;;  %v449_v32 = vsel %vm448_vm9, %v970_v8, %v445_v24  ;;  %v1207_v33 = vpop.xlane.xlu0 %394  ;;  %655 = vmatpush.bf16.msra.mxu1 %v646_v29  ;;  %v1209_v35 = vpop.eup %975  ;;  %v414_v39 = vmul.f32 %v974_v30, %v1200_v12  ;;  %v408_v34 = vand.u32 2147483647, %v1197_v9  ;;  %vm406_vm13 = vmor %vm404_vm12, %vm405_vm11 }
 0x2e6   :  { %v454_v36 = vsel %vm451_vm10, %v453_v27, %v449_v32  ;;  %v401_v38 = vsub.f32 1.0, %v400_v28  ;;  %977 = vrcp.f32 %v1207_v33  ;;  %v470_v47 = vmul.f32 %v1209_v35, %v1195_v7 }
 0x2e7   :  { %v514_v40 = vmul.f32 %v1157_v37, %v454_v36  ;;  %v415_v46 = vsub.f32 1.0, %v414_v39  ;;  %v521_v48 = vpack.c.bf16 %v513_v31, %v513_v31  ;;  %v424_v37 = vand.u32 2147483648, %v1200_v12 }
 0x2e8   :  { %v402_v44 = vmul.f32 %v972_v22, %v401_v38  ;;  %vm419_vm14 = vweird.f32 %v974_v30  ;;  %vm409_vm15 = vcmp.eq.f32.partialorder %v408_v34, 8.507059e+37  ;;  %v471_v61 = vsub.f32 1.0, %v470_v47 }
 0x2e9   :  { %v522_v49 = vpack.c.bf16 %v514_v40, %v514_v40  ;;  %v416_v52 = vmul.f32 %v974_v30, %v415_v46  ;;  %894 = vmatmul.msk.bf16.vlgmr.msrb.gmra.mxu1 %vm174_vm1, %v521_v48  ;;  %vm420_vm3 = vmor %vm418_vm0, %vm419_vm14  ;;  %v425_v2 = vor.u32 1.1754944e-38, %v424_v37  ;;  %v494_v10 = vand.u32 2147483648, %v1207_v33 }
 0x2ea   :  { %v403_v50 = vadd.f32 %v972_v22, %v402_v44  ;;  %v472_v9 = vmul.f32 %v1209_v35, %v471_v61  ;;  %vm488_vm6 = vweird.f32 %v1207_v33  ;;  %vm475_vm7 = vweird.f32 %v1209_v35 }
 0x2eb   :  { %895 = vmatmul.msk.bf16.vlgmr.msrb.gmra.mxu2 %vm174_vm1, %v522_v49  ;;  %v143_v56 = vpop.permute.xlu2 %142  ;;  %v417_v58 = vadd.f32 %v974_v30, %v416_v52  ;;  %v495_v17 = vor.u32 1.1754944e-38, %v494_v10  ;;  %vm474_vm10 = vweird.f32 %v1195_v7  ;;  %v918_v10 = vld [vmem:[%s1287_s4 + $0x8] sm:$0xff] }
 0x2ec   :  { %v407_v57 = vsel %vm406_vm13, %v972_v22, %v403_v50  ;;  %v608_v59 = vsel %vm530_vm2, %v143_v56, 0  ;;  %v978_v60 = vpop.eup %977  ;;  %v473_v16 = vadd.f32 %v1209_v35, %v472_v9  ;;  %vm476_vm11 = vmor %vm474_vm10, %vm475_vm7  ;;  %vm479_vm13 = vcmp.eq.f32.partialorder %v478_v20, 8.507059e+37 }
 0x2ed   :  { %v412_v62 = vsel %vm409_vm15, %v411_v54, %v407_v57  ;;  %v398_v63 = vpop.xlane.xlu0 %397  ;;  %617 = vmatpush.bf16.msrb.mxu3 %v608_v59  ;;  %v484_v3 = vmul.f32 %v978_v60, %v1207_v33  ;;  %v421_v4 = vsel %vm420_vm3, %v974_v30, %v417_v58  ;;  %vm489_vm5 = vweird.f32 %v978_v60 }
 0x2ee   :  { %v511_v0 = vmul.f32 %v1165_v43, %v412_v62  ;;  %979 = vrcp.f32 %v398_v63  ;;  %v426_v8 = vsel %vm423_vm4, %v425_v2, %v421_v4  ;;  %v492_v43 = vand.u32 2147483647, %v1207_v33  ;;  %vm490_vm8 = vmor %vm488_vm6, %vm489_vm5 }
 0x2ef   :  { %v485_v5 = vsub.f32 1.0, %v484_v3  ;;  %v512_v11 = vmul.f32 %v1167_v45, %v426_v8  ;;  %v480_v45 = vand.u32 2147483648, %v1195_v7  ;;  %v508_v24 = vand.u32 2147483648, %v398_v63 }
 0x2f0   :  { %v519_v6 = vpack.c.bf16 %v511_v0, %v511_v0  ;;  %vm493_vm9 = vcmp.eq.f32.partialorder %v492_v43, 8.507059e+37  ;;  %v477_v25 = vsel %vm476_vm11, %v1209_v35, %v473_v16  ;;  %v506_v27 = vand.u32 2147483647, %v398_v63 }
 0x2f1   :  { %v486_v12 = vmul.f32 %v978_v60, %v485_v5  ;;  %v520_v13 = vpack.c.bf16 %v512_v11, %v512_v11  ;;  %v481_v28 = vor.u32 1.1754944e-38, %v480_v45  ;;  %vm502_vm14 = vweird.f32 %v398_v63 }
 0x2f2   :  { %892 = vmatmul.msk.bf16.vlgmr.msra.gmra.mxu3 %vm174_vm1, %v519_v6  ;;  %v509_v32 = vor.u32 1.1754944e-38, %v508_v24  ;;  %vm507_vm0 = vcmp.eq.f32.partialorder %v506_v27, 8.507059e+37  ;;  %vm693_vm6 = vcmask 130048   ;;  %vm695_vm7 = vcmask 195584   ;;  %v950_v27 = vld [vmem:[%s1288_s5] ss:$0 sm:$0xff] }
 0x2f3   :  { %v487_v15 = vadd.f32 %v978_v60, %v486_v12  ;;  %893 = vmatmul.msk.bf16.vlgmr.msrb.gmra.mxu0 %vm174_vm1, %v520_v13  ;;  %v482_v31 = vsel %vm479_vm13, %v481_v28, %v477_v25  ;;  %743 = vmatpush.bf16.msra.mxu3 %v918_v10  ;;  %v917_v12 = vld [vmem:[%s1287_s4] sm:$0xff]  ;;  %vm825_vm10 = vcmask 1040384   ;;  %s1022_s5 = smov [#allocation2]   ;;  %vm831_vm11 = vcmask 1041408  }
 0x2f4   :  { %v980_v14 = vpop.eup %979 }
 0x2f5   :  { %v498_v18 = vmul.f32 %v980_v14, %v398_v63  ;;  %v491_v19 = vsel %vm490_vm8, %v978_v60, %v487_v15  ;;  %vm503_vm12 = vweird.f32 %v980_v14  ;;  %vm733_vm8 = vcmask 261120  }
 0x2f6   :  { %v496_v21 = vsel %vm493_vm9, %v495_v17, %v491_v19  ;;  %vm504_vm15 = vmor %vm502_vm14, %vm503_vm12  ;;  %vm781_vm9 = vcmask 785408  }
 0x2f7   :  { %v499_v22 = vsub.f32 1.0, %v498_v18  ;;  %v517_v23 = vmul.f32 %v1175_v51, %v496_v21  ;;  %v516_v51 = vmul.f32 %v1163_v41, %v482_v31  ;;  %744 = vmatpush.bf16.msra.mxu3 %v917_v12 }
 0x2f9   :  { %v500_v26 = vmul.f32 %v980_v14, %v499_v22  ;;  %v525_v29 = vpack.c.bf16 %v517_v23, %v517_v23  ;;  %v524_v40 = vpack.c.bf16 %v516_v51, %v516_v51 }
 0x2fb   :  { %v501_v30 = vadd.f32 %v980_v14, %v500_v26  ;;  %898 = vmatmul.msk.bf16.vlgmr.msra.gmra.mxu1 %vm174_vm1, %v525_v29 }
 0x2fd   :  { %v505_v7 = vsel %vm504_vm15, %v980_v14, %v501_v30 }
 0x2fe   :  { %v510_v33 = vsel %vm507_vm0, %v509_v32, %v505_v7 }
 0x2ff   :  { %v518_v35 = vmul.f32 %v1179_v53, %v510_v33 }
 0x300   :  { %v145_v36 = vpop.permute.xlu0 %144 }
 0x301   :  { %v627_v38 = vsel %vm530_vm2, %v145_v36, 0  ;;  %v526_v39 = vpack.c.bf16 %v518_v35, %v518_v35 }
 0x302   :  { %636 = vmatpush.bf16.msra.mxu0 %v627_v38 }
 0x303   :  { %899 = vmatmul.msk.bf16.vlgmr.msra.gmra.mxu2 %vm174_vm1, %v526_v39 }
 0x305   :  { %897 = vmatmul.msk.bf16.vlgmr.msra.gmra.mxu0 %vm174_vm1, %v524_v40 }
 0x32b   :  { %v389_v42 = vpop.xlane.xlu0 %388 }
 0x32c   :  { %981 = vrcp.f32 %v389_v42  ;;  %v466_v47 = vand.u32 2147483648, %v389_v42  ;;  %v464_v41 = vand.u32 2147483647, %v389_v42  ;;  %vm460_vm4 = vweird.f32 %v389_v42 }
 0x32e   :  { %v467_v49 = vor.u32 1.1754944e-38, %v466_v47  ;;  %vm465_vm2 = vcmp.eq.f32.partialorder %v464_v41, 8.507059e+37 }
 0x332   :  { %v982_v44 = vpop.eup %981 }
 0x333   :  { %v456_v34 = vmul.f32 %v982_v44, %v389_v42  ;;  %vm461_vm3 = vweird.f32 %v982_v44 }
 0x334   :  { %vm462_vm5 = vmor %vm460_vm4, %vm461_vm3 }
 0x335   :  { %v457_v46 = vsub.f32 1.0, %v456_v34 }
 0x337   :  { %v458_v48 = vmul.f32 %v982_v44, %v457_v46 }
 0x339   :  { %v459_v53 = vadd.f32 %v982_v44, %v458_v48 }
 0x33b   :  { %v463_v50 = vsel %vm462_vm5, %v982_v44, %v459_v53 }
 0x33c   :  { %v468_v52 = vsel %vm465_vm2, %v467_v49, %v463_v50 }
 0x33d   :  { %v515_v37 = vmul.f32 %v1191_v1, %v468_v52 }
 0x33f   :  { %v523_v54 = vpack.c.bf16 %v515_v37, %v515_v37 }
 0x341   :  { %896 = vmatmul.msk.bf16.vlgmr.msrb.gmra.mxu3 %vm174_vm1, %v523_v54 }
 0x366   :  { %v581_v55 = vpop.f32.mrf.mxu1 }
 0x36e   :  { %v600_v56 = vpop.f32.mrf.mxu2  ;;  %v583_v57 = vpop.f32.mrf.mxu1 }
 0x370   :  { %v562_v58 = vpop.f32.mrf.mxu0 }
 0x375   :  { %v543_v59 = vpop.f32.mrf.mxu3 }
 0x376   :  { %v602_v60 = vpop.f32.mrf.mxu2 }
 0x378   :  { %v657_v61 = vpop.f32.mrf.mxu1  ;;  %v564_v62 = vpop.f32.mrf.mxu0 }
 0x379   :  { %v940_v63 = vpack.i.bf16 %v657_v61, %v581_v55 }
 0x37b   :  { %941 = vrot.lane.b32.xlu1 %v940_v63, %s1017_s3 }
 0x37d   :  { %v545_v0 = vpop.f32.mrf.mxu3 }
 0x380   :  { %v659_v2 = vpop.f32.mrf.mxu1 }
 0x382   :  { %v638_v3 = vpop.f32.mrf.mxu0 }
 0x383   :  { %v935_v4 = vpack.i.bf16 %v638_v3, %v562_v58 }
 0x385   :  { %936 = vrot.lane.b32.xlu2 %v935_v4, %s1018_s13 }
 0x386   :  { %v676_v1 = vpop.f32.mrf.mxu2 }
 0x387   :  { %v945_v6 = vpack.i.bf16 %v676_v1, %v600_v56 }
 0x38a   :  { %v640_v5 = vpop.f32.mrf.mxu0 }
 0x38d   :  { %946 = vrot.lane.b32.xlu2 %v945_v6, %s1019_s14 }
 0x38e   :  { %v678_v8 = vpop.f32.mrf.mxu2 }
 0x3c4   :  { %v619_v9 = vpop.f32.mrf.mxu3 }
 0x3cc   :  { %v621_v11 = vpop.f32.mrf.mxu3 }
 0x3df   :  { %v937_v43 = vpop.permute.xlu2 %936 }
 0x3e0   :  { %v939_v13 = vunpack.i.h.bf16 %v937_v43  ;;  %v938_v14 = vunpack.i.l.bf16 %v937_v43 }
 0x3e2   :  { %v692_v45 = vsel %vm174_vm1, %v543_v59, %v938_v14  ;;  %v709_v19 = vsel %vm174_vm1, %v619_v9, %v939_v13  ;;  %vm779_vm1 = vcmask 523264  }
 0x3e7   :  { %v947_v15 = vpop.permute.xlu2 %946 }
 0x3e8   :  { %v949_v20 = vunpack.i.h.bf16 %v947_v15  ;;  %v948_v21 = vunpack.i.l.bf16 %v947_v15 }
 0x3ed   :  { %v942_v16 = vpop.permute.xlu1 %941 }
 0x3ee   :  { %v944_v17 = vunpack.i.h.bf16 %v942_v16  ;;  %v943_v18 = vunpack.i.l.bf16 %v942_v16 }
 0x3f0   :  { %v710_v22 = vsel %vm693_vm6, %v709_v19, %v944_v17  ;;  %v694_v23 = vsel %vm693_vm6, %v692_v45, %v943_v18 }
 0x3f1   :  { %v711_v24 = vsel %vm695_vm7, %v710_v22, %v949_v20  ;;  %v696_v25 = vsel %vm695_vm7, %v694_v23, %v948_v21 }
 0x3f2   :  { %v712_v26 = vpack.c.bf16 %v711_v24, %v696_v25 }
 0x3f4   :  { %908 = vmatmul.msk.bf16.vlgmr.msra.gmra.mxu3 %vm733_vm8, %v712_v26 }
 0x477   :  { %v746_v28 = vpop.f32.mrf.mxu3 }
 0x478   :  { %v747_v29 = vadd.f32 %v950_v27, %v746_v28 }
 0x47a   :  { %v774_v30 = vrot.slane %v747_v29, 7  ;;  %v766_v31 = vrot.slane %v747_v29, 5  ;;  %v770_v35 = vrot.slane %v747_v29, 6  ;;  %v752_v39 = vrot.slane %v747_v29, 1 }
 0x47b   :  { %v756_v42 = vrot.slane %v747_v29, 2  ;;  %v760_v34 = vrot.slane %v747_v29, 3  ;;  %v764_v37 = vrot.slane %v747_v29, 4 }
 0x47c   :  { %775 = vrot.lane.b32.xlu2 %v774_v30, %s1011_s1  ;;  %767 = vrot.lane.b32.xlu1 %v766_v31, %s1020_s19 }
 0x47f   :  { %v748_v32 = vpop.f32.mrf.mxu3 }
 0x480   :  { %v749_v7 = vadd.f32 %v950_v27, %v748_v32 }
 0x482   :  { %v787_v33 = vrot.slane %v749_v7, 1  ;;  %v801_v51 = vrot.slane %v749_v7, 5  ;;  %v795_v36 = vrot.slane %v749_v7, 3  ;;  %v805_v38 = vrot.slane %v749_v7, 6 }
 0x483   :  { %v809_v40 = vrot.slane %v749_v7, 7  ;;  %v791_v44 = vrot.slane %v749_v7, 2  ;;  %v799_v52 = vrot.slane %v749_v7, 4 }
 0x484   :  { %788 = vrot.lane.b32.xlu0 %v787_v33, %s1020_s19  ;;  %802 = vrot.lane.b32.xlu2 %v801_v51, %s1020_s19 }
 0x485   :  { %771 = vrot.lane.b32.xlu1 %v770_v35, %s1021_s20 }
 0x48c   :  { %796 = vrot.lane.b32.xlu0 %v795_v36, %s1011_s1  ;;  %806 = vrot.lane.b32.xlu2 %v805_v38, %s1021_s20 }
 0x48d   :  { %753 = vrot.lane.b32.xlu1 %v752_v39, %s1020_s19 }
 0x494   :  { %810 = vrot.lane.b32.xlu2 %v809_v40, %s1011_s1 }
 0x495   :  { %757 = vrot.lane.b32.xlu1 %v756_v42, %s1021_s20 }
 0x49c   :  { %792 = vrot.lane.b32.xlu2 %v791_v44, %s1021_s20 }
 0x4a4   :  { %761 = vrot.lane.b32.xlu2 %v760_v34, %s1011_s1  ;;  %s840_s1 = sshll.u32 %s1022_s5, 4  ;;  %s841_s1 = int_to_ptr.vmem [resolvable:$true] %s840_s1 }
 0x4d6   :  { %v776_v46 = vpop.permute.xlu2 %775 }
 0x4de   :  { %v803_v47 = vpop.permute.xlu2 %802 }
 0x4df   :  { %v816_v55 = vsel %vm733_vm8, %v799_v52, %v803_v47 }
 0x4e6   :  { %v807_v48 = vpop.permute.xlu2 %806 }
 0x4e7   :  { %v817_v58 = vsel %vm779_vm1, %v816_v55, %v807_v48 }
 0x4ee   :  { %v768_v41 = vpop.permute.xlu1 %767  ;;  %v811_v53 = vpop.permute.xlu2 %810 }
 0x4ef   :  { %v783_v56 = vsel %vm733_vm8, %v764_v37, %v768_v41  ;;  %v818_v60 = vsel %vm781_vm9, %v817_v58, %v811_v53 }
 0x4f0   :  { %v822_v0 = vrot.slane %v818_v60, 7 }
 0x4f6   :  { %v789_v50 = vpop.permute.xlu0 %788  ;;  %v793_v54 = vpop.permute.xlu2 %792 }
 0x4f7   :  { %v772_v49 = vpop.permute.xlu1 %771  ;;  %v813_v61 = vsel %vm733_vm8, %v749_v7, %v789_v50 }
 0x4f8   :  { %v784_v59 = vsel %vm779_vm1, %v783_v56, %v772_v49  ;;  %v814_v2 = vsel %vm779_vm1, %v813_v61, %v793_v54 }
 0x4f9   :  { %v785_v63 = vsel %vm781_vm9, %v784_v59, %v776_v46 }
 0x4fa   :  { %v827_v4 = vsel %vm825_vm10, %v785_v63, %v822_v0 }
 0x4fb   :  { %v830_v10 = vrot.slane %v827_v4, 6 }
 0x4fe   :  { %v797_v62 = vpop.permute.xlu0 %796  ;;  %v762_v8 = vpop.permute.xlu2 %761 }
 0x4ff   :  { %v754_v57 = vpop.permute.xlu1 %753  ;;  %v815_v3 = vsel %vm781_vm9, %v814_v2, %v797_v62 }
 0x500   :  { %v778_v1 = vsel %vm733_vm8, %v747_v29, %v754_v57  ;;  %v821_v6 = vrot.slane %v815_v3, 7 }
 0x507   :  { %v758_v5 = vpop.permute.xlu1 %757 }
 0x508   :  { %v780_v9 = vsel %vm779_vm1, %v778_v1, %v758_v5 }
 0x509   :  { %v782_v11 = vsel %vm781_vm9, %v780_v9, %v762_v8 }
 0x50a   :  { %v826_v12 = vsel %vm825_vm10, %v782_v11, %v821_v6 }
 0x50b   :  { %v832_v43 = vsel %vm831_vm11, %v826_v12, %v830_v10 }
 0x50c   :  { %834 = vst [vmem:[#allocation2] sm:$0xf] %v832_v43 }
 0x50d   :  { %845 = dma.vmem_to_hbm [thread:$0]  %s841_s1, 64, %s843_s23, [#allocation3]  }
 0x50e   :  { %1007 = dma.done.wait [#allocation3], 64  }
 0x50f   :  { %1008 = vsyncadd [#allocation3], 4294967232 }
 0x510   :  { %850 = vsyncpa [#allocation3], 1 }

</bundles_post_ra>
